<compile_context>
chip_gen: v7x
topology: tpu7x:2x2x1
jax: 0.10.0
libtpu: 0.0.40
codegen_flags: <defaults>
</compile_context>

<pallas_src>
import jax
import jax.numpy as jnp
from jax.experimental import pallas as pl
from jax.experimental.pallas import tpu as pltpu

# ---- model hyperparameters (PyTorch module defaults) ----
INPUT_DIM = 32
NUM_EXPERTS = 3
NUM_TASKS = 2
EXPERT_HIDDEN = (128, 64)        # expert_hidden_dims
TOWER_HIDDEN = (64, 32)          # tower_hidden_dims
TASK_OUT_DIM = 1                 # task_output_dims = [1, 1]
BATCH = 8

H1, H2 = EXPERT_HIDDEN
T1, T2 = TOWER_HIDDEN
E, T = NUM_EXPERTS, NUM_TASKS

GATE_OFF = E * H1                # 384: gate logits start (lane-aligned) in stage-1 output
GATE_W = 8                       # padded gate-logit lanes (6 real + 2 zero pad)
FUSED1_WIDTH = 512               # stage-1 fused output width (384 expert + 6 gate + pad)
MIX_W = T * E * H2               # 384: per-task-duplicated expert-output layout
TOWER1_W = T * T1                # 128
TOWER2_W = T * T2                # 64
OUT_WIDTH = 128                  # lane-dense output slab: [preds(2) | gates(6) | pad]


def _round_up(x, m):
    return ((x + m - 1) // m) * m


# --------------------------------------------------------------------------------------
# Kernel
# --------------------------------------------------------------------------------------
def _mmoe_kernel(x_ref,                       # (tb, 32)   bf16
                 w1_ref, b1_ref,              # (32, 512)  bf16 / (1, 512) f32
                 w2_ref, b2_ref,              # (384, 384) bf16 / (1, 384) f32
                 sum_sel_ref,                 # (8, 8)     f32   per-task softmax denom
                 rep_sel_ref,                 # (8, 384)   bf16  gate -> expert slab
                 shift_sel_ref,               # (8, 128)   f32   gate -> output lanes 2:8
                 tw1_ref, tb1_ref,            # (384, 128) bf16 / (1, 128) f32
                 tw2_ref, tb2_ref,            # (128, 64)  bf16 / (1, 64)  f32
                 tw3_ref, tb3_ref,            # (64, 128)  bf16 / (1, 128) f32
                 out_ref):                    # (tb, 128)  f32
    x = x_ref[...]

    # ---- stage 1: one bf16 matmul = all expert first layers + both linear gates
    h_cat = jnp.dot(x, w1_ref[...], preferred_element_type=jnp.float32) + b1_ref[...]

    # ---- gate softmax (lane-wise except one tiny reduce + selector matmul)
    glog = h_cat[:, GATE_OFF:GATE_OFF + GATE_W]            # (tb, 8); lanes 6,7 are 0
    # Subtracting the GLOBAL row-max is softmax-invariant per task and keeps exp() safe
    # for any realistic logit range of this model.
    m = jnp.max(glog, axis=-1, keepdims=True)
    ex = jnp.exp(glog - m)
    denom = jnp.dot(ex, sum_sel_ref[...], preferred_element_type=jnp.float32)
    g = ex * pl.reciprocal(denom, approx=True)             # (tb, 8) per-task softmax (EUP)

    # ---- stage 2: per-task-duplicated block-diagonal expert second layers
    h_exp = jnp.maximum(h_cat[:, :GATE_OFF], 0.0).astype(jnp.bfloat16)   # (tb, 384)
    ocat = jnp.maximum(
        jnp.dot(h_exp, w2_ref[...], preferred_element_type=jnp.float32) + b2_ref[...],
        0.0)                                               # (tb, 384) = [task0: o0|o1|o2 | task1: ...]

    # ---- stage 3: replicate gates across each expert's 64-lane slab (MXU), mix on VPU
    g_rep = jnp.dot(g.astype(jnp.bfloat16), rep_sel_ref[...],
                    preferred_element_type=jnp.float32)    # (tb, 384)
    weighted = (ocat * g_rep).astype(jnp.bfloat16)         # (tb, 384) lane-wise

    # ---- stage 4: towers; the expert sum is folded into tw1 (rows repeated per expert)
    t1 = jnp.maximum(
        jnp.dot(weighted, tw1_ref[...], preferred_element_type=jnp.float32) + tb1_ref[...],
        0.0)                                               # (tb, 128)
    t2 = jnp.maximum(
        jnp.dot(t1.astype(jnp.bfloat16), tw2_ref[...],
                preferred_element_type=jnp.float32) + tb2_ref[...],
        0.0)                                               # (tb, 64)
    head = jnp.dot(t2.astype(jnp.bfloat16), tw3_ref[...],
                   preferred_element_type=jnp.float32) + tb3_ref[...]   # (tb, 128): preds @ lanes 0:2

    # ---- stage 5: place gates into lanes 2:8 via a 0/1 selector matmul; single dense store
    out_ref[...] = head + jnp.dot(g, shift_sel_ref[...], preferred_element_type=jnp.float32)


# --------------------------------------------------------------------------------------
# One-time weight packing (run OUTSIDE the per-call jitted path; cache the result)
# --------------------------------------------------------------------------------------
def pack_params(p):
    """Fuse / block-diagonalize the raw per-expert / per-task weights once."""
    f32 = jnp.float32
    bf = jnp.bfloat16

    # stage 1: [expert-l1 x3 (128 each) | gate x2 (3 each) | zero pad] -> (32, 512)
    w1 = jnp.zeros((INPUT_DIM, FUSED1_WIDTH), f32)
    b1 = jnp.zeros((1, FUSED1_WIDTH), f32)
    for e in range(E):
        w1 = w1.at[:, e * H1:(e + 1) * H1].set(p["ew1"][e])
        b1 = b1.at[:, e * H1:(e + 1) * H1].set(p["eb1"][e])
    for t in range(T):
        c0 = GATE_OFF + t * E
        w1 = w1.at[:, c0:c0 + E].set(p["gw"][t])
        b1 = b1.at[:, c0:c0 + E].set(p["gb"][t])

    # stage 2: per-task-duplicated block-diagonal expert layer-2 -> (384, 384)
    w2 = jnp.zeros((E * H1, MIX_W), f32)
    b2 = jnp.zeros((1, MIX_W), f32)
    for t in range(T):
        for e in range(E):
            r0, c0 = e * H1, t * E * H2 + e * H2
            w2 = w2.at[r0:r0 + H1, c0:c0 + H2].set(p["ew2"][e])
            b2 = b2.at[:, c0:c0 + H2].set(p["eb2"][e])

    # gate selector constants (0/1), padded to GATE_W = 8 logit lanes
    sum_sel = jnp.zeros((GATE_W, GATE_W), f32)
    rep_sel = jnp.zeros((GATE_W, MIX_W), f32)
    shift_sel = jnp.zeros((GATE_W, OUT_WIDTH), f32)
    for t in range(T):
        sum_sel = sum_sel.at[t * E:(t + 1) * E, t * E:(t + 1) * E].set(1.0)
        for e in range(E):
            gidx = t * E + e
            rep_sel = rep_sel.at[gidx, t * E * H2 + e * H2: t * E * H2 + (e + 1) * H2].set(1.0)
            shift_sel = shift_sel.at[gidx, T + gidx].set(1.0)
    # pad logit lanes (6,7): give them the full-row sum as denominator so their (unused)
    # normalized values stay finite (the global-max lane always contributes exp(0)=1).
    sum_sel = sum_sel.at[:, T * E:].set(1.0)

    # towers: expert-sum folded into tw1 (rows repeated per expert), block-diag over tasks
    tw1 = jnp.zeros((MIX_W, TOWER1_W), f32)
    tb1 = jnp.zeros((1, TOWER1_W), f32)
    tw2 = jnp.zeros((TOWER1_W, TOWER2_W), f32)
    tb2 = jnp.zeros((1, TOWER2_W), f32)
    tw3 = jnp.zeros((TOWER2_W, OUT_WIDTH), f32)       # head directly emits the (B,128) slab
    tb3 = jnp.zeros((1, OUT_WIDTH), f32)
    for t in range(T):
        for e in range(E):
            r0 = t * E * H2 + e * H2
            tw1 = tw1.at[r0:r0 + H2, t * T1:(t + 1) * T1].set(p["tw1"][t])
        tb1 = tb1.at[:, t * T1:(t + 1) * T1].set(p["tb1"][t])
        tw2 = tw2.at[t * T1:(t + 1) * T1, t * T2:(t + 1) * T2].set(p["tw2"][t])
        tb2 = tb2.at[:, t * T2:(t + 1) * T2].set(p["tb2"][t])
        tw3 = tw3.at[t * T2:(t + 1) * T2, t:t + 1].set(p["tw3"][t])
        tb3 = tb3.at[:, t:t + 1].set(p["tb3"][t])

    return (w1.astype(bf), b1,
            w2.astype(bf), b2,
            sum_sel, rep_sel.astype(bf), shift_sel,
            tw1.astype(bf), tb1,
            tw2.astype(bf), tb2,
            tw3.astype(bf), tb3)


# --------------------------------------------------------------------------------------
# Wrapper
# --------------------------------------------------------------------------------------
def _choose_tile_b(B):
    # Large, lane/sublane-dense tiles amortize the ~0.35 us/grid-step overhead; keep >=2
    # grid steps when possible so v7x's 2 TensorCores both get work. Caps stay well inside
    # v7x's 64 MiB VMEM and v5e's raised scoped limit.
    if B >= 2048:
        return 1024
    if B >= 1024:
        return 512
    if B >= 512:
        return 256
    return _round_up(B, 8)          # small batches: one padded tile


@jax.jit
def mmoe_forward(x, packed):
    """MMoE forward in one Pallas kernel; `packed` must come from pack_params()."""
    B, D = x.shape
    tile_b = _choose_tile_b(B)
    b_pad = pl.cdiv(B, tile_b) * tile_b
    grid = (b_pad // tile_b,)

    xb = x.astype(jnp.bfloat16)
    if b_pad != B:
        xb = jnp.pad(xb, ((0, b_pad - B), (0, 0)))   # padded rows are discarded below

    def const_spec(arr):
        return pl.BlockSpec(arr.shape, lambda i: (0, 0))

    out = pl.pallas_call(
        _mmoe_kernel,
        out_shape=jax.ShapeDtypeStruct((b_pad, OUT_WIDTH), jnp.float32),
        grid=grid,
        in_specs=[pl.BlockSpec((tile_b, D), lambda i: (i, 0))]
                 + [const_spec(w) for w in packed],
        out_specs=pl.BlockSpec((tile_b, OUT_WIDTH), lambda i: (i, 0)),
        compiler_params=pltpu.CompilerParams(
            dimension_semantics=("parallel",),
            vmem_limit_bytes=48 * 1024 * 1024),
    )(xb, *packed)

    out = out[:B]
    # unpack the lane-dense slab: lanes [0:T] = preds, [T:T+T*E] = gate weights
    task_predictions = [out[:, t:t + 1] for t in range(T)]
    expert_weights = [out[:, T + t * E: T + (t + 1) * E] for t in range(T)]
    return task_predictions, expert_weights


# --------------------------------------------------------------------------------------
# Parameter init + pure-JAX reference (for the correctness check)
# --------------------------------------------------------------------------------------
def init_params(key):
    """Deterministic parameter init (Kaiming-uniform-ish scale, like nn.Linear)."""
    ks = list(jax.random.split(key, 16))

    def lin(k, fan_in, shape):
        bound = 1.0 / jnp.sqrt(fan_in)
        return jax.random.uniform(k, shape, jnp.float32, -bound, bound)

    D = INPUT_DIM
    return {
        "ew1": lin(ks[0], D, (E, D, H1)),
        "eb1": lin(ks[1], D, (E, 1, H1)),
        "ew2": lin(ks[2], H1, (E, H1, H2)),
        "eb2": lin(ks[3], H1, (E, 1, H2)),
        "gw": lin(ks[4], D, (T, D, E)),
        "gb": lin(ks[5], D, (T, 1, E)),
        "tw1": lin(ks[6], H2, (T, H2, T1)),
        "tb1": lin(ks[7], H2, (T, 1, T1)),
        "tw2": lin(ks[8], T1, (T, T1, T2)),
        "tb2": lin(ks[9], T1, (T, 1, T2)),
        "tw3": lin(ks[10], T2, (T, T2, TASK_OUT_DIM)),
        "tb3": lin(ks[11], T2, (T, 1, TASK_OUT_DIM)),
    }


def mmoe_reference(x, p):
    """Pure-JAX f32 reference of the PyTorch forward (eval mode)."""
    outs = []
    for e in range(E):
        h = jax.nn.relu(x @ p["ew1"][e] + p["eb1"][e])
        o = jax.nn.relu(h @ p["ew2"][e] + p["eb2"][e])
        outs.append(o)
    expert_outputs = jnp.stack(outs, axis=1)                 # (B, E, H2)
    preds, gates = [], []
    for t in range(T):
        g = jax.nn.softmax(x @ p["gw"][t] + p["gb"][t], axis=-1)
        gates.append(g)
        ti = jnp.sum(expert_outputs * g[:, :, None], axis=1)
        h1 = jax.nn.relu(ti @ p["tw1"][t] + p["tb1"][t])
        h2 = jax.nn.relu(h1 @ p["tw2"][t] + p["tb2"][t])
        preds.append(h2 @ p["tw3"][t] + p["tb3"][t])
    return preds, gates


if __name__ == "__main__":
    key = jax.random.PRNGKey(0)
    k_x, k_p = jax.random.split(key)
    params = init_params(k_p)
    packed = pack_params(params)       # packed ONCE, outside the jitted per-call path

    x = jax.random.normal(k_x, (BATCH, INPUT_DIM), jnp.float32)
    task_preds, gate_weights = mmoe_forward(x, packed)
    jax.block_until_ready(task_preds)

    # Tolerance is loose (2e-2) because the kernel runs all matmuls with bf16 operands
    # (f32 accumulation) and uses the approx EUP reciprocal for the softmax denominator;
    # returned gate rows therefore sum to 1 only to ~1e-3 level.
    ref_preds, ref_gates = mmoe_reference(x, params)
    for a, b in zip(task_preds, ref_preds):
        assert a.shape == (BATCH, TASK_OUT_DIM)
        assert jnp.allclose(a, b, rtol=2e-2, atol=2e-2)
    for a, b in zip(gate_weights, ref_gates):
        assert a.shape == (BATCH, NUM_EXPERTS)
        assert jnp.allclose(a, b, rtol=2e-2, atol=2e-2)

    # second (non-multiple-of-8) batch exercises the batch-padding + tiling path
    x2 = jax.random.normal(jax.random.PRNGKey(1), (13, INPUT_DIM), jnp.float32)
    preds2, gates2 = mmoe_forward(x2, packed)
    jax.block_until_ready(preds2)
    ref_preds2, ref_gates2 = mmoe_reference(x2, params)
    for a, b in zip(preds2, ref_preds2):
        assert jnp.allclose(a, b, rtol=2e-2, atol=2e-2)
    for a, b in zip(gates2, ref_gates2):
        assert jnp.allclose(a, b, rtol=2e-2, atol=2e-2)

    print("KERNEL_OK")
</pallas_src>

<mosaic_0001>
module attributes {stable_mosaic.version = 11 : i64} {
  func.func @_mmoe_kernel(%arg0: i32, %arg1: memref<8x32xbf16, #tpu.memory_space<vmem>>, %arg2: memref<32x512xbf16, #tpu.memory_space<vmem>>, %arg3: memref<1x512xf32, #tpu.memory_space<vmem>>, %arg4: memref<384x384xbf16, #tpu.memory_space<vmem>>, %arg5: memref<1x384xf32, #tpu.memory_space<vmem>>, %arg6: memref<8x8xf32, #tpu.memory_space<vmem>>, %arg7: memref<8x384xbf16, #tpu.memory_space<vmem>>, %arg8: memref<8x128xf32, #tpu.memory_space<vmem>>, %arg9: memref<384x128xbf16, #tpu.memory_space<vmem>>, %arg10: memref<1x128xf32, #tpu.memory_space<vmem>>, %arg11: memref<128x64xbf16, #tpu.memory_space<vmem>>, %arg12: memref<1x64xf32, #tpu.memory_space<vmem>>, %arg13: memref<64x128xbf16, #tpu.memory_space<vmem>>, %arg14: memref<1x128xf32, #tpu.memory_space<vmem>>, %arg15: memref<8x128xf32, #tpu.memory_space<vmem>>) attributes {dimension_semantics = [#tpu.dimension_semantics<parallel>], iteration_bounds = array<i64: 1>, scalar_prefetch = 0 : i64, scratch_operands = 0 : i64, tpu.core_type = #tpu.core_type<tc>, window_params = [{transform_indices = @transform_0, window_bounds = array<i64: 8, 32>}, {pipeline_mode = #tpu.pipeline_mode<synchronous>, transform_indices = @transform_1, window_bounds = array<i64: 32, 512>}, {pipeline_mode = #tpu.pipeline_mode<synchronous>, transform_indices = @transform_2, window_bounds = array<i64: 1, 512>}, {pipeline_mode = #tpu.pipeline_mode<synchronous>, transform_indices = @transform_3, window_bounds = array<i64: 384, 384>}, {pipeline_mode = #tpu.pipeline_mode<synchronous>, transform_indices = @transform_4, window_bounds = array<i64: 1, 384>}, {pipeline_mode = #tpu.pipeline_mode<synchronous>, transform_indices = @transform_5, window_bounds = array<i64: 8, 8>}, {pipeline_mode = #tpu.pipeline_mode<synchronous>, transform_indices = @transform_6, window_bounds = array<i64: 8, 384>}, {pipeline_mode = #tpu.pipeline_mode<synchronous>, transform_indices = @transform_7, window_bounds = array<i64: 8, 128>}, {pipeline_mode = #tpu.pipeline_mode<synchronous>, transform_indices = @transform_8, window_bounds = array<i64: 384, 128>}, {pipeline_mode = #tpu.pipeline_mode<synchronous>, transform_indices = @transform_9, window_bounds = array<i64: 1, 128>}, {pipeline_mode = #tpu.pipeline_mode<synchronous>, transform_indices = @transform_10, window_bounds = array<i64: 128, 64>}, {pipeline_mode = #tpu.pipeline_mode<synchronous>, transform_indices = @transform_11, window_bounds = array<i64: 1, 64>}, {pipeline_mode = #tpu.pipeline_mode<synchronous>, transform_indices = @transform_12, window_bounds = array<i64: 64, 128>}, {pipeline_mode = #tpu.pipeline_mode<synchronous>, transform_indices = @transform_13, window_bounds = array<i64: 1, 128>}, {transform_indices = @transform_14, window_bounds = array<i64: 8, 128>}]} {
    %c0 = arith.constant 0 : index
    %c0_0 = arith.constant 0 : index
    %0 = vector.load %arg1[%c0, %c0_0] : memref<8x32xbf16, #tpu.memory_space<vmem>>, vector<8x32xbf16>
    %c0_1 = arith.constant 0 : index
    %c0_2 = arith.constant 0 : index
    %1 = vector.load %arg2[%c0_1, %c0_2] : memref<32x512xbf16, #tpu.memory_space<vmem>>, vector<32x512xbf16>
    %cst = arith.constant dense<0.000000e+00> : vector<8x512xf32>
    %2 = tpu.matmul %0, %1, %cst {dimension_numbers = #tpu.dot_dimension_numbers<[1], [0], [0], [1], [0, 0, 1, 1], [], []>} : vector<8x32xbf16>, vector<32x512xbf16>, vector<8x512xf32> -> vector<8x512xf32>
    %c0_3 = arith.constant 0 : index
    %c0_4 = arith.constant 0 : index
    %3 = vector.load %arg3[%c0_3, %c0_4] : memref<1x512xf32, #tpu.memory_space<vmem>>, vector<1x512xf32>
    %4 = vector.broadcast %3 : vector<1x512xf32> to vector<8x512xf32>
    %5 = arith.addf %2, %4 : vector<8x512xf32>
    %6 = vector.extract_strided_slice %5 {offsets = [0, 384], sizes = [8, 8], strides = [1, 1]} : vector<8x512xf32> to vector<8x8xf32>
    %cst_5 = arith.constant dense<0xFF800000> : vector<8xf32>
    %7 = vector.multi_reduction <maximumf>, %6, %cst_5 [1] : vector<8x8xf32> to vector<8xf32>
    %8 = vector.shape_cast %7 : vector<8xf32> to vector<8x1xf32>
    %9 = vector.broadcast %8 : vector<8x1xf32> to vector<8x8xf32>
    %10 = arith.subf %6, %9 : vector<8x8xf32>
    %11 = math.exp %10 : vector<8x8xf32>
    %c0_6 = arith.constant 0 : index
    %c0_7 = arith.constant 0 : index
    %12 = vector.load %arg6[%c0_6, %c0_7] : memref<8x8xf32, #tpu.memory_space<vmem>>, vector<8x8xf32>
    %cst_8 = arith.constant dense<0.000000e+00> : vector<8x8xf32>
    %13 = tpu.matmul %11, %12, %cst_8 {dimension_numbers = #tpu.dot_dimension_numbers<[1], [0], [0], [1], [0, 0, 1, 1], [], []>} : vector<8x8xf32>, vector<8x8xf32>, vector<8x8xf32> -> vector<8x8xf32>
    %14 = tpu.reciprocal %13 {approx = true} : vector<8x8xf32> -> vector<8x8xf32>
    %15 = arith.mulf %11, %14 : vector<8x8xf32>
    %16 = vector.extract_strided_slice %5 {offsets = [0, 0], sizes = [8, 384], strides = [1, 1]} : vector<8x512xf32> to vector<8x384xf32>
    %cst_9 = arith.constant 0.000000e+00 : f32
    %17 = vector.broadcast %cst_9 : f32 to vector<8x384xf32>
    %18 = arith.maximumf %16, %17 : vector<8x384xf32>
    %19 = arith.truncf %18 : vector<8x384xf32> to vector<8x384xbf16>
    %c0_10 = arith.constant 0 : index
    %c0_11 = arith.constant 0 : index
    %20 = vector.load %arg4[%c0_10, %c0_11] : memref<384x384xbf16, #tpu.memory_space<vmem>>, vector<384x384xbf16>
    %cst_12 = arith.constant dense<0.000000e+00> : vector<8x384xf32>
    %21 = tpu.matmul %19, %20, %cst_12 {dimension_numbers = #tpu.dot_dimension_numbers<[1], [0], [0], [1], [0, 0, 1, 1], [], []>} : vector<8x384xbf16>, vector<384x384xbf16>, vector<8x384xf32> -> vector<8x384xf32>
    %c0_13 = arith.constant 0 : index
    %c0_14 = arith.constant 0 : index
    %22 = vector.load %arg5[%c0_13, %c0_14] : memref<1x384xf32, #tpu.memory_space<vmem>>, vector<1x384xf32>
    %23 = vector.broadcast %22 : vector<1x384xf32> to vector<8x384xf32>
    %24 = arith.addf %21, %23 : vector<8x384xf32>
    %cst_15 = arith.constant 0.000000e+00 : f32
    %25 = vector.broadcast %cst_15 : f32 to vector<8x384xf32>
    %26 = arith.maximumf %24, %25 : vector<8x384xf32>
    %27 = arith.truncf %15 : vector<8x8xf32> to vector<8x8xbf16>
    %c0_16 = arith.constant 0 : index
    %c0_17 = arith.constant 0 : index
    %28 = vector.load %arg7[%c0_16, %c0_17] : memref<8x384xbf16, #tpu.memory_space<vmem>>, vector<8x384xbf16>
    %cst_18 = arith.constant dense<0.000000e+00> : vector<8x384xf32>
    %29 = tpu.matmul %27, %28, %cst_18 {dimension_numbers = #tpu.dot_dimension_numbers<[1], [0], [0], [1], [0, 0, 1, 1], [], []>} : vector<8x8xbf16>, vector<8x384xbf16>, vector<8x384xf32> -> vector<8x384xf32>
    %30 = arith.mulf %26, %29 : vector<8x384xf32>
    %31 = arith.truncf %30 : vector<8x384xf32> to vector<8x384xbf16>
    %c0_19 = arith.constant 0 : index
    %c0_20 = arith.constant 0 : index
    %32 = vector.load %arg9[%c0_19, %c0_20] : memref<384x128xbf16, #tpu.memory_space<vmem>>, vector<384x128xbf16>
    %cst_21 = arith.constant dense<0.000000e+00> : vector<8x128xf32>
    %33 = tpu.matmul %31, %32, %cst_21 {dimension_numbers = #tpu.dot_dimension_numbers<[1], [0], [0], [1], [0, 0, 1, 1], [], []>} : vector<8x384xbf16>, vector<384x128xbf16>, vector<8x128xf32> -> vector<8x128xf32>
    %c0_22 = arith.constant 0 : index
    %c0_23 = arith.constant 0 : index
    %34 = vector.load %arg10[%c0_22, %c0_23] : memref<1x128xf32, #tpu.memory_space<vmem>>, vector<1x128xf32>
    %35 = vector.broadcast %34 : vector<1x128xf32> to vector<8x128xf32>
    %36 = arith.addf %33, %35 : vector<8x128xf32>
    %cst_24 = arith.constant 0.000000e+00 : f32
    %37 = vector.broadcast %cst_24 : f32 to vector<8x128xf32>
    %38 = arith.maximumf %36, %37 : vector<8x128xf32>
    %39 = arith.truncf %38 : vector<8x128xf32> to vector<8x128xbf16>
    %c0_25 = arith.constant 0 : index
    %c0_26 = arith.constant 0 : index
    %40 = vector.load %arg11[%c0_25, %c0_26] : memref<128x64xbf16, #tpu.memory_space<vmem>>, vector<128x64xbf16>
    %cst_27 = arith.constant dense<0.000000e+00> : vector<8x64xf32>
    %41 = tpu.matmul %39, %40, %cst_27 {dimension_numbers = #tpu.dot_dimension_numbers<[1], [0], [0], [1], [0, 0, 1, 1], [], []>} : vector<8x128xbf16>, vector<128x64xbf16>, vector<8x64xf32> -> vector<8x64xf32>
    %c0_28 = arith.constant 0 : index
    %c0_29 = arith.constant 0 : index
    %42 = vector.load %arg12[%c0_28, %c0_29] : memref<1x64xf32, #tpu.memory_space<vmem>>, vector<1x64xf32>
    %43 = vector.broadcast %42 : vector<1x64xf32> to vector<8x64xf32>
    %44 = arith.addf %41, %43 : vector<8x64xf32>
    %cst_30 = arith.constant 0.000000e+00 : f32
    %45 = vector.broadcast %cst_30 : f32 to vector<8x64xf32>
    %46 = arith.maximumf %44, %45 : vector<8x64xf32>
    %47 = arith.truncf %46 : vector<8x64xf32> to vector<8x64xbf16>
    %c0_31 = arith.constant 0 : index
    %c0_32 = arith.constant 0 : index
    %48 = vector.load %arg13[%c0_31, %c0_32] : memref<64x128xbf16, #tpu.memory_space<vmem>>, vector<64x128xbf16>
    %cst_33 = arith.constant dense<0.000000e+00> : vector<8x128xf32>
    %49 = tpu.matmul %47, %48, %cst_33 {dimension_numbers = #tpu.dot_dimension_numbers<[1], [0], [0], [1], [0, 0, 1, 1], [], []>} : vector<8x64xbf16>, vector<64x128xbf16>, vector<8x128xf32> -> vector<8x128xf32>
    %c0_34 = arith.constant 0 : index
    %c0_35 = arith.constant 0 : index
    %50 = vector.load %arg14[%c0_34, %c0_35] : memref<1x128xf32, #tpu.memory_space<vmem>>, vector<1x128xf32>
    %51 = vector.broadcast %50 : vector<1x128xf32> to vector<8x128xf32>
    %52 = arith.addf %49, %51 : vector<8x128xf32>
    %c0_36 = arith.constant 0 : index
    %c0_37 = arith.constant 0 : index
    %53 = vector.load %arg8[%c0_36, %c0_37] : memref<8x128xf32, #tpu.memory_space<vmem>>, vector<8x128xf32>
    %cst_38 = arith.constant dense<0.000000e+00> : vector<8x128xf32>
    %54 = tpu.matmul %15, %53, %cst_38 {dimension_numbers = #tpu.dot_dimension_numbers<[1], [0], [0], [1], [0, 0, 1, 1], [], []>} : vector<8x8xf32>, vector<8x128xf32>, vector<8x128xf32> -> vector<8x128xf32>
    %55 = arith.addf %52, %54 : vector<8x128xf32>
    %c0_39 = arith.constant 0 : index
    %c0_40 = arith.constant 0 : index
    %56 = vector.load %arg15[%c0_39, %c0_40] : memref<8x128xf32, #tpu.memory_space<vmem>>, vector<8x128xf32>
    tpu.vector_store %arg15[%c0_39, %c0_40], %55 {strides = array<i32>} : memref<8x128xf32, #tpu.memory_space<vmem>>, vector<8x128xf32>,
    return
  }
  func.func @transform_0(%arg0: i32) -> (i32, i32) {
    %c0_i32 = arith.constant 0 : i32
    %c0_i32_0 = arith.constant 0 : i32
    return %arg0, %c0_i32 : i32, i32
  }
  func.func @transform_1(%arg0: i32) -> (i32, i32) {
    %c0_i32 = arith.constant 0 : i32
    %c0_i32_0 = arith.constant 0 : i32
    %c0_i32_1 = arith.constant 0 : i32
    return %c0_i32, %c0_i32_0 : i32, i32
  }
  func.func @transform_2(%arg0: i32) -> (i32, i32) {
    %c0_i32 = arith.constant 0 : i32
    %c0_i32_0 = arith.constant 0 : i32
    %c0_i32_1 = arith.constant 0 : i32
    return %c0_i32, %c0_i32_0 : i32, i32
  }
  func.func @transform_3(%arg0: i32) -> (i32, i32) {
    %c0_i32 = arith.constant 0 : i32
    %c0_i32_0 = arith.constant 0 : i32
    %c0_i32_1 = arith.constant 0 : i32
    return %c0_i32, %c0_i32_0 : i32, i32
  }
  func.func @transform_4(%arg0: i32) -> (i32, i32) {
    %c0_i32 = arith.constant 0 : i32
    %c0_i32_0 = arith.constant 0 : i32
    %c0_i32_1 = arith.constant 0 : i32
    return %c0_i32, %c0_i32_0 : i32, i32
  }
  func.func @transform_5(%arg0: i32) -> (i32, i32) {
    %c0_i32 = arith.constant 0 : i32
    %c0_i32_0 = arith.constant 0 : i32
    %c0_i32_1 = arith.constant 0 : i32
    return %c0_i32, %c0_i32_0 : i32, i32
  }
  func.func @transform_6(%arg0: i32) -> (i32, i32) {
    %c0_i32 = arith.constant 0 : i32
    %c0_i32_0 = arith.constant 0 : i32
    %c0_i32_1 = arith.constant 0 : i32
    return %c0_i32, %c0_i32_0 : i32, i32
  }
  func.func @transform_7(%arg0: i32) -> (i32, i32) {
    %c0_i32 = arith.constant 0 : i32
    %c0_i32_0 = arith.constant 0 : i32
    %c0_i32_1 = arith.constant 0 : i32
    return %c0_i32, %c0_i32_0 : i32, i32
  }
  func.func @transform_8(%arg0: i32) -> (i32, i32) {
    %c0_i32 = arith.constant 0 : i32
    %c0_i32_0 = arith.constant 0 : i32
    %c0_i32_1 = arith.constant 0 : i32
    return %c0_i32, %c0_i32_0 : i32, i32
  }
  func.func @transform_9(%arg0: i32) -> (i32, i32) {
    %c0_i32 = arith.constant 0 : i32
    %c0_i32_0 = arith.constant 0 : i32
    %c0_i32_1 = arith.constant 0 : i32
    return %c0_i32, %c0_i32_0 : i32, i32
  }
  func.func @transform_10(%arg0: i32) -> (i32, i32) {
    %c0_i32 = arith.constant 0 : i32
    %c0_i32_0 = arith.constant 0 : i32
    %c0_i32_1 = arith.constant 0 : i32
    return %c0_i32, %c0_i32_0 : i32, i32
  }
  func.func @transform_11(%arg0: i32) -> (i32, i32) {
    %c0_i32 = arith.constant 0 : i32
    %c0_i32_0 = arith.constant 0 : i32
    %c0_i32_1 = arith.constant 0 : i32
    return %c0_i32, %c0_i32_0 : i32, i32
  }
  func.func @transform_12(%arg0: i32) -> (i32, i32) {
    %c0_i32 = arith.constant 0 : i32
    %c0_i32_0 = arith.constant 0 : i32
    %c0_i32_1 = arith.constant 0 : i32
    return %c0_i32, %c0_i32_0 : i32, i32
  }
  func.func @transform_13(%arg0: i32) -> (i32, i32) {
    %c0_i32 = arith.constant 0 : i32
    %c0_i32_0 = arith.constant 0 : i32
    %c0_i32_1 = arith.constant 0 : i32
    return %c0_i32, %c0_i32_0 : i32, i32
  }
  func.func @transform_14(%arg0: i32) -> (i32, i32) {
    %c0_i32 = arith.constant 0 : i32
    %c0_i32_0 = arith.constant 0 : i32
    return %arg0, %c0_i32 : i32, i32
  }
}

</mosaic_0001>

<bundles_post_ra>
// kernel: mmoe_forward.1
= control target key start
LH: loop header
LB: loop body
LE: loop exit
PB: predicated region body
PF: predicated region fallthrough
CT: control target
= control target key end

     0   :  { %19 = vsyncpa [#allocation3], 0  ;;  %s2603_s0 = inlined_call_operand.vmem [shape: bf16[8,32], index: 0, kind: input, shape index: {}]   ;;  %s2604_s1 = inlined_call_operand.vmem [shape: bf16[32,512], index: 1, kind: input, shape index: {}]   ;;  %s2605_s2 = inlined_call_operand.vmem [shape: f32[1,512], index: 2, kind: input, shape index: {}]   ;;  %s2606_s3 = inlined_call_operand.hbm [shape: bf16[384,384], index: 3, kind: input, shape index: {}]   ;;  %s2607_s4 = inlined_call_operand.hbm [shape: f32[1,384], index: 4, kind: input, shape index: {}]   ;;  %s2608_s5 = inlined_call_operand.hbm [shape: f32[8,8], index: 5, kind: input, shape index: {}]   ;;  %s2609_s6 = inlined_call_operand.vmem [shape: bf16[8,384], index: 6, kind: input, shape index: {}]   ;;  %s2610_s7 = inlined_call_operand.hbm [shape: f32[8,128], index: 7, kind: input, shape index: {}]   ;;  %s2611_s8 = inlined_call_operand.hbm [shape: bf16[384,128], index: 8, kind: input, shape index: {}]   ;;  %s2612_s9 = inlined_call_operand.vmem [shape: f32[1,128], index: 9, kind: input, shape index: {}]   ;;  %s2613_s10 = inlined_call_operand.vmem [shape: bf16[128,64], index: 10, kind: input, shape index: {}]   ;;  %s2614_s11 = inlined_call_operand.vmem [shape: f32[1,64], index: 11, kind: input, shape index: {}]   ;;  %s2615_s12 = inlined_call_operand.vmem [shape: bf16[64,128], index: 12, kind: input, shape index: {}]   ;;  %s2616_s13 = inlined_call_operand.vmem [shape: f32[1,128], index: 13, kind: input, shape index: {}]   ;;  %s2617_s14 = inlined_call_operand.vmem [shape: f32[8,128], index: 14, kind: output, shape index: {}]  }
   0x1   :  { %20 = vsyncpa [#allocation5], 0 }
   0x2   :  { %21 = vsyncpa [#allocation8], 0  ;;  %s2274_s29 = smov [#allocation4]   ;;  %s2275_s15 = smov [#allocation7]  }
   0x3   :  { %s46_s30 = sshll.u32 %s2274_s29, 4  ;;  %s68_s16 = sshll.u32 %s2275_s15, 4  ;;  %s47_s30 = int_to_ptr.vmem [resolvable:$true] %s46_s30  ;;  %s69_s16 = int_to_ptr.vmem [resolvable:$true] %s68_s16 }
   0x4   :  { %s2158_s19 = scalar_lea.hbm %s2607_s4, 48 }
   0x5   :  { %p2159_p0 = scmp.ne.s32.totalorder %s2607_s4, %s2158_s19  ;;  %p2162_p1 = scmp.lt.u32.totalorder %s2158_s19, %s2607_s4 }
   0x7   :  { %p2164_p2 = pnand %p2162_p1, %p2159_p0 }
   0x9   :  { %2167 = shalt.err (!%p2164_p2)
}
   0xa   :  { %s2168_s24 = scalar_lea.vmem %s47_s30, 48  ;;  %s2172_s25 = scalar_lea.vmem %s47_s30, 64 }
   0xb   :  { %p2169_p3 = scmp.ne.s32.totalorder %s47_s30, %s2168_s24  ;;  %p2173_p4 = scmp.lt.s32.totalorder %s47_s30, %s47_s30 }
   0xc   :  { %p2174_p5 = scmp.lt.s32.totalorder %s2172_s25, %s2168_s24 }
   0xe   :  { %p2175_p6 = por %p2174_p5, %p2173_p4 }
  0x10   :  { %p2176_p7 = pnand %p2175_p6, %p2169_p3 }
  0x12   :  { %2179 = shalt.err (!%p2176_p7)
}
  0x13   :  { %49 = dma.hbm_to_vmem [thread:$0]  %s2607_s4, 48, %s47_s30, [#allocation5]  }
  0x14   :  { %s2180_s15 = scalar_lea.hbm %s2610_s7, 128 }
  0x15   :  { %p2181_p8 = scmp.ne.s32.totalorder %s2610_s7, %s2180_s15  ;;  %p2184_p9 = scmp.lt.u32.totalorder %s2180_s15, %s2610_s7 }
  0x17   :  { %p2186_p10 = pnand %p2184_p9, %p2181_p8 }
  0x19   :  { %2189 = shalt.err (!%p2186_p10)
}
  0x1a   :  { %s2190_s21 = scalar_lea.vmem %s69_s16, 128  ;;  %p2195_p12 = scmp.lt.s32.totalorder %s69_s16, %s69_s16 }
  0x1b   :  { %p2191_p11 = scmp.ne.s32.totalorder %s69_s16, %s2190_s21  ;;  %p2196_p13 = scmp.lt.s32.totalorder %s2190_s21, %s2190_s21 }
  0x1d   :  { %p2197_p0 = por %p2196_p13, %p2195_p12 }
  0x1f   :  { %p2198_p1 = pnand %p2197_p0, %p2191_p11 }
  0x21   :  { %2201 = shalt.err (!%p2198_p1)
}
  0x22   :  { %71 = dma.hbm_to_vmem [thread:$0]  %s2610_s7, 128, %s69_s16, [#allocation8]  }
  0x23   :  { %s2276_s22 = smov [#allocation2]   ;;  %s2202_s26 = scalar_lea.hbm %s2606_s3, 9216 }
  0x24   :  { %s33_s23 = sshll.u32 %s2276_s22, 4  ;;  %p2203_p2 = scmp.ne.s32.totalorder %s2606_s3, %s2202_s26  ;;  %s34_s23 = int_to_ptr.vmem [resolvable:$true] %s33_s23 }
  0x25   :  { %p2206_p3 = scmp.lt.u32.totalorder %s2202_s26, %s2606_s3 }
  0x27   :  { %p2208_p4 = pnand %p2206_p3, %p2203_p2 }
  0x29   :  { %2211 = shalt.err (!%p2208_p4)
}
  0x2a   :  { %s2212_s17 = scalar_lea.vmem %s34_s23, 9216  ;;  %p2217_p6 = scmp.lt.s32.totalorder %s34_s23, %s34_s23 }
  0x2b   :  { %p2213_p5 = scmp.ne.s32.totalorder %s34_s23, %s2212_s17  ;;  %p2218_p7 = scmp.lt.s32.totalorder %s2212_s17, %s2212_s17 }
  0x2d   :  { %p2219_p8 = por %p2218_p7, %p2217_p6 }
  0x2f   :  { %p2220_p9 = pnand %p2219_p8, %p2213_p5 }
  0x31   :  { %2223 = shalt.err (!%p2220_p9)
}
  0x32   :  { %s2277_s7 = smov 192   ;;  %s2278_s16 = smov 12  }
  0x33   :  { %39 = dma.hbm_to_vmem [thread:$0]  %s2606_s3, 9216, %s34_s23, [#allocation3], %s2277_s7, %s2277_s7, %s2278_s16  }
  0x34   :  { %s2279_s20 = smov [#allocation6]   ;;  %s2280_s4 = smov [#allocation9]  }
  0x35   :  { %s56_s21 = sshll.u32 %s2279_s20, 4  ;;  %s77_s30 = sshll.u32 %s2280_s4, 4  ;;  %s57_s21 = int_to_ptr.vmem [resolvable:$true] %s56_s21  ;;  %s78_s30 = int_to_ptr.vmem [resolvable:$true] %s77_s30 }
  0x36   :  { %s2224_s25 = scalar_lea.hbm %s2608_s5, 128 }
  0x37   :  { %p2225_p10 = scmp.ne.s32.totalorder %s2608_s5, %s2224_s25  ;;  %p2228_p11 = scmp.lt.u32.totalorder %s2224_s25, %s2608_s5 }
  0x39   :  { %p2230_p12 = pnand %p2228_p11, %p2225_p10 }
  0x3b   :  { %2233 = shalt.err (!%p2230_p12)
}
  0x3c   :  { %s2234_s3 = scalar_lea.vmem %s57_s21, 128  ;;  %p2239_p0 = scmp.lt.s32.totalorder %s57_s21, %s57_s21 }
  0x3d   :  { %p2235_p13 = scmp.ne.s32.totalorder %s57_s21, %s2234_s3  ;;  %p2240_p1 = scmp.lt.s32.totalorder %s2234_s3, %s2234_s3 }
  0x3f   :  { %p2241_p2 = por %p2240_p1, %p2239_p0 }
  0x41   :  { %p2242_p3 = pnand %p2241_p2, %p2235_p13 }
  0x43   :  { %2245 = shalt.err (!%p2242_p3)
}
  0x44   :  { %59 = dma.hbm_to_vmem [thread:$0]  %s2608_s5, 128, %s57_s21, [#allocation5]  }
  0x45   :  { %s2246_s16 = scalar_lea.hbm %s2611_s8, 3072 }
  0x46   :  { %p2247_p4 = scmp.ne.s32.totalorder %s2611_s8, %s2246_s16  ;;  %p2250_p5 = scmp.lt.u32.totalorder %s2246_s16, %s2611_s8 }
  0x48   :  { %p2252_p6 = pnand %p2250_p5, %p2247_p4 }
  0x4a   :  { %2255 = shalt.err (!%p2252_p6)
}
  0x4b   :  { %s2256_s22 = scalar_lea.vmem %s78_s30, 3072  ;;  %p2261_p8 = scmp.lt.s32.totalorder %s78_s30, %s78_s30 }
  0x4c   :  { %p2257_p7 = scmp.ne.s32.totalorder %s78_s30, %s2256_s22  ;;  %p2262_p9 = scmp.lt.s32.totalorder %s2256_s22, %s2256_s22 }
  0x4e   :  { %p2263_p10 = por %p2262_p9, %p2261_p8 }
  0x50   :  { %p2264_p11 = pnand %p2263_p10, %p2257_p7 }
  0x52   :  { %2267 = shalt.err (!%p2264_p11)
}
  0x53   :  { %s2281_s5 = smov 64   ;;  %s2282_s21 = smov 4  }
  0x54   :  { %83 = dma.hbm_to_vmem [thread:$0]  %s2611_s8, 3072, %s78_s30, [#allocation8], %s2281_s5, %s2281_s5, %s2282_s21  }
  0x55   :  { %2268 = dma.done.wait [#allocation3], 9216  }
  0x56   :  { %2269 = vsyncadd [#allocation3], 4294958080 }
  0x57   :  { %2270 = dma.done.wait [#allocation5], 176  }
  0x58   :  { %2271 = vsyncadd [#allocation5], 4294967120 }
  0x59   :  { %2272 = dma.done.wait [#allocation8], 3200  }
  0x5a   :  { %2273 = vsyncadd [#allocation8], 4294964096  ;;  %v2283_v0 = vmov 0   ;;  %v2007_v1 = vld [vmem:[%s2604_s1 + $0x4] ss:$16 sps:$4 sm:$0xff]   ;;  %vm181_vm0 = vcmask 261120   ;;  %v121_v43 = vlaneseq }
  0x5b   :  { %217 = vmatprep.mubr.bf16.mxu0 %v2283_v0  ;;  %258 = vmatprep.mubr.bf16.mxu1 %v2283_v0  ;;  %v2009_v2 = vld [vmem:[%s2604_s1 + $0xc] ss:$16 sps:$4 sm:$0xff]   ;;  %v2011_v3 = vld [vmem:[%s2604_s1] ss:$16 sps:$4 sm:$0xff]   ;;  %v2012_v4 = vld [vmem:[%s2604_s1 + $0x8] ss:$16 sps:$4 sm:$0xff]  }
  0x5c   :  { %185 = vmatprep.subr.bf16.mxu0 %v2007_v1  ;;  %226 = vmatprep.subr.bf16.mxu1 %v2009_v2  ;;  %v2013_v5 = vld [vmem:[%s2604_s1 + $0x24] ss:$16 sps:$4 sm:$0xff]   ;;  %v2015_v6 = vld [vmem:[%s2604_s1 + $0x2c] ss:$16 sps:$4 sm:$0xff]   ;;  %v2017_v7 = vld [vmem:[%s2604_s1 + $0x20] ss:$16 sps:$4 sm:$0xff]  }
  0x5d   :  { %186 = vmatpush1.bf16.msra.mxu0 %v2011_v3  ;;  %227 = vmatpush1.bf16.msra.mxu1 %v2012_v4  ;;  %v2018_v8 = vld [vmem:[%s2604_s1 + $0x28] ss:$16 sps:$4 sm:$0xff]   ;;  %v2021_v9 = vld [vmem:[#allocation2 + $0x4] ss:$12 sps:$4 sm:$0xff]   ;;  %v110_v10 = vld [vmem:[%s2603_s0] sm:$0xf] }
  0x5e   :  { %187 = vmatprep.subr.bf16.mxu0 %v2013_v5  ;;  %228 = vmatprep.subr.bf16.mxu1 %v2015_v6  ;;  %v2019_v11 = vld [vmem:[#allocation2] ss:$12 sps:$4 sm:$0xff]   ;;  %v2024_v12 = vld [vmem:[#allocation2 + $0x1c] ss:$12 sps:$4 sm:$0xff]   ;;  %v2022_v13 = vld [vmem:[#allocation2 + $0x18] ss:$12 sps:$4 sm:$0xff]  }
  0x5f   :  { %v2027_v14 = vld [vmem:[#allocation2 + $0x34] ss:$12 sps:$4 sm:$0xff]   ;;  %v2025_v15 = vld [vmem:[#allocation2 + $0x30] ss:$12 sps:$4 sm:$0xff]   ;;  %v2030_v16 = vld [vmem:[#allocation2 + $0x4c] ss:$12 sps:$4 sm:$0xff]  }
  0x60   :  { %v2028_v17 = vld [vmem:[#allocation2 + $0x48] ss:$12 sps:$4 sm:$0xff]   ;;  %v2033_v18 = vld [vmem:[#allocation2 + $0x64] ss:$12 sps:$4 sm:$0xff]   ;;  %v2031_v19 = vld [vmem:[#allocation2 + $0x60] ss:$12 sps:$4 sm:$0xff]  }
  0x61   :  { %188 = vmatpush1.bf16.msra.mxu0 %v2017_v7  ;;  %229 = vmatpush1.bf16.msra.mxu1 %v2018_v8  ;;  %v2036_v20 = vld [vmem:[#allocation2 + $0x7c] ss:$12 sps:$4 sm:$0xff]   ;;  %v2034_v21 = vld [vmem:[#allocation2 + $0x78] ss:$12 sps:$4 sm:$0xff]   ;;  %v2039_v22 = vld [vmem:[#allocation2 + $0x94] ss:$12 sps:$4 sm:$0xff]  }
  0x62   :  { %853 = vmatprep.subr.bf16.mxu1 %v2021_v9  ;;  %v2037_v23 = vld [vmem:[#allocation2 + $0x90] ss:$12 sps:$4 sm:$0xff]   ;;  %v2042_v24 = vld [vmem:[#allocation2 + $0xac] ss:$12 sps:$4 sm:$0xff]   ;;  %v2040_v25 = vld [vmem:[#allocation2 + $0xa8] ss:$12 sps:$4 sm:$0xff]  }
  0x63   :  { %v2045_v26 = vld [vmem:[#allocation2 + $0xc4] ss:$12 sps:$4 sm:$0xff]   ;;  %v2043_v27 = vld [vmem:[#allocation2 + $0xc0] ss:$12 sps:$4 sm:$0xff]   ;;  %v2048_v28 = vld [vmem:[#allocation2 + $0xdc] ss:$12 sps:$4 sm:$0xff]  }
  0x64   :  { %1697 = vmatmul.mubr.msk.bf16.vlgmr.msra.gmra.mrb[0].mxu0 %vm181_vm0, %v110_v10  ;;  %1698 = vmatmul.mubr.msk.bf16.vlgmr.msra.gmra.mrb[0].mxu1 %vm181_vm0, %v110_v10  ;;  %v2046_v29 = vld [vmem:[#allocation2 + $0xd8] ss:$12 sps:$4 sm:$0xff]   ;;  %v2051_v30 = vld [vmem:[#allocation2 + $0xf4] ss:$12 sps:$4 sm:$0xff]   ;;  %v2049_v31 = vld [vmem:[#allocation2 + $0xf0] ss:$12 sps:$4 sm:$0xff]  }
  0x65   :  { %854 = vmatpush1.bf16.msra.mxu1 %v2019_v11  ;;  %v2054_v32 = vld [vmem:[#allocation2 + $0x10c] ss:$12 sps:$4 sm:$0xff]   ;;  %v2052_v33 = vld [vmem:[#allocation2 + $0x108] ss:$12 sps:$4 sm:$0xff]   ;;  %v2057_v34 = vld [vmem:[#allocation2 + $0x124] ss:$12 sps:$4 sm:$0xff]  }
  0x66   :  { %855 = vmatprep.subr.bf16.mxu1 %v2024_v12  ;;  %v2055_v35 = vld [vmem:[#allocation2 + $0x120] ss:$12 sps:$4 sm:$0xff]   ;;  %v2060_v36 = vld [vmem:[#allocation2 + $0x13c] ss:$12 sps:$4 sm:$0xff]   ;;  %v2058_v37 = vld [vmem:[#allocation2 + $0x138] ss:$12 sps:$4 sm:$0xff]  }
  0x67   :  { %v2063_v38 = vld [vmem:[#allocation2 + $0x154] ss:$12 sps:$4 sm:$0xff]   ;;  %v2061_v39 = vld [vmem:[#allocation2 + $0x150] ss:$12 sps:$4 sm:$0xff]   ;;  %v2066_v40 = vld [vmem:[#allocation2 + $0x16c] ss:$12 sps:$4 sm:$0xff]  }
  0x68   :  { %v2064_v41 = vld [vmem:[#allocation2 + $0x168] ss:$12 sps:$4 sm:$0xff]   ;;  %v2069_v42 = vld [vmem:[#allocation2 + $0x184] ss:$12 sps:$4 sm:$0xff]   ;;  %v2450_v44 = vshrl.u32 %v121_v43, 7  ;;  %vm267_vm1 = vcmask 64512  }
  0x69   :  { %856 = vmatpush1.bf16.msra.mxu1 %v2022_v13  ;;  %v119_v48 = vld [vmem:[%s2605_s2] sm:$0xf]  ;;  %v2072_v6 = vld [vmem:[#allocation2 + $0x19c] ss:$12 sps:$4 sm:$0xff]   ;;  %v2070_v7 = vld [vmem:[#allocation2 + $0x198] ss:$12 sps:$4 sm:$0xff]  }
  0x6a   :  { %857 = vmatprep.subr.bf16.mxu1 %v2027_v14  ;;  %v123_v45 = vsub.s32 0, %v2450_v44  ;;  %v127_v46 = vsub.s32 1, %v2450_v44  ;;  %v135_v47 = vsub.s32 3, %v2450_v44  ;;  %v2067_v5 = vld [vmem:[#allocation2 + $0x180] ss:$12 sps:$4 sm:$0xff]   ;;  %vm2285_vm2 = vmmov 0  }
  0x6b   :  { %v2075_v8 = vld [vmem:[#allocation2 + $0x1b4] ss:$12 sps:$4 sm:$0xff]   ;;  %v2073_v9 = vld [vmem:[#allocation2 + $0x1b0] ss:$12 sps:$4 sm:$0xff]   ;;  %v2078_v10 = vld [vmem:[#allocation2 + $0x1cc] ss:$12 sps:$4 sm:$0xff]  }
  0x6c   :  { %v124_v49 = vrot.slane %v119_v48, %v123_v45  ;;  %v128_v50 = vrot.slane %v119_v48, %v127_v46  ;;  %v136_v51 = vrot.slane %v119_v48, %v135_v47  ;;  %v2076_v11 = vld [vmem:[#allocation2 + $0x1c8] ss:$12 sps:$4 sm:$0xff]   ;;  %v2081_v12 = vld [vmem:[#allocation2 + $0x1e4] ss:$12 sps:$4 sm:$0xff]   ;;  %v2079_v13 = vld [vmem:[#allocation2 + $0x1e0] ss:$12 sps:$4 sm:$0xff]  }
  0x6d   :  { %858 = vmatpush1.bf16.msra.mxu1 %v2025_v15  ;;  %v2084_v14 = vld [vmem:[#allocation2 + $0x1fc] ss:$12 sps:$4 sm:$0xff]   ;;  %v131_v15 = vsub.s32 2, %v2450_v44  ;;  %v2103_v43 = vld [vmem:[#allocation2 + $0x158] ss:$12 sps:$4 sm:$0xff]   ;;  %vm1032_vm3 = vcmask 1043456  }
  0x6e   :  { %859 = vmatprep.subr.bf16.mxu1 %v2030_v16  ;;  %v274_v16 = vld [vmem:[#allocation6] sm:$0xff]  ;;  %vm1562_vm4 = vcmask 523264  }
  0x6f   :  { %v2104_v47 = vld [vmem:[#allocation2 + $0x98] ss:$12 sps:$4 sm:$0xff]  }
  0x71   :  { %860 = vmatpush1.bf16.msra.mxu1 %v2028_v17  ;;  %v2091_v17 = vld [vmem:[#allocation2 + $0xc8] ss:$12 sps:$4 sm:$0xff]  }
  0x72   :  { %861 = vmatprep.subr.bf16.mxu1 %v2033_v18  ;;  %v2284_v18 = vmov 0.0  }
  0x73   :  { %1901 = vmatprep.subr.mxu0 %v2284_v18  ;;  %1903 = vmatprep.mubr.msk.f32.mxu0 %vm2285_vm2, %v2284_v18 }
  0x74   :  { %1902 = vmatpush3.msra.mxu0 %v274_v16  ;;  %v2119_v16 = vld [vmem:[#allocation9] sm:$0xff]  }
  0x75   :  { %862 = vmatpush1.bf16.msra.mxu1 %v2031_v19  ;;  %v2082_v19 = vld [vmem:[#allocation2 + $0x1f8] ss:$12 sps:$4 sm:$0xff]   ;;  %1821 = vmatprep.subr.bf16.mxu0 %v2091_v17  ;;  %v2120_v17 = vld [vmem:[#allocation9 + $0x48] sm:$0xff]  }
  0x76   :  { %863 = vmatprep.subr.bf16.mxu1 %v2036_v20  ;;  %v132_v20 = vrot.slane %v119_v48, %v131_v15  ;;  %v2105_v48 = vld [vmem:[#allocation2 + $0x170] ss:$12 sps:$4 sm:$0xff]  }
  0x79   :  { %864 = vmatpush1.bf16.msra.mxu1 %v2034_v21  ;;  %v2087_v21 = vld [vmem:[#allocation2 + $0x214] ss:$12 sps:$4 sm:$0xff]  }
  0x7a   :  { %865 = vmatprep.subr.bf16.mxu1 %v2039_v22  ;;  %v2085_v22 = vld [vmem:[#allocation2 + $0x210] ss:$12 sps:$4 sm:$0xff]  }
  0x7d   :  { %866 = vmatpush1.bf16.msra.mxu1 %v2037_v23 }
  0x7e   :  { %867 = vmatprep.subr.bf16.mxu1 %v2042_v24  ;;  %v2090_v24 = vld [vmem:[#allocation2 + $0x22c] ss:$12 sps:$4 sm:$0xff]  }
  0x81   :  { %868 = vmatpush1.bf16.msra.mxu1 %v2040_v25  ;;  %v2088_v25 = vld [vmem:[#allocation2 + $0x228] ss:$12 sps:$4 sm:$0xff]  }
  0x82   :  { %869 = vmatprep.subr.bf16.mxu1 %v2045_v26 }
  0x85   :  { %870 = vmatpush1.bf16.msra.mxu1 %v2043_v27 }
  0x86   :  { %871 = vmatprep.subr.bf16.mxu1 %v2048_v28 }
  0x89   :  { %872 = vmatpush1.bf16.msra.mxu1 %v2046_v29 }
  0x8a   :  { %873 = vmatprep.subr.bf16.mxu1 %v2051_v30 }
  0x8d   :  { %874 = vmatpush1.bf16.msra.mxu1 %v2049_v31  ;;  %v2092_v31 = vld [vmem:[#allocation2 + $0x8] ss:$12 sps:$4 sm:$0xff]  }
  0x8e   :  { %875 = vmatprep.subr.bf16.mxu1 %v2054_v32  ;;  %v2093_v32 = vld [vmem:[#allocation2 + $0xe0] ss:$12 sps:$4 sm:$0xff]  }
  0x91   :  { %876 = vmatpush1.bf16.msra.mxu1 %v2052_v33 }
  0x92   :  { %877 = vmatprep.subr.bf16.mxu1 %v2057_v34  ;;  %v2094_v34 = vld [vmem:[#allocation2 + $0x20] ss:$12 sps:$4 sm:$0xff]  }
  0x95   :  { %878 = vmatpush1.bf16.msra.mxu1 %v2055_v35  ;;  %v2095_v35 = vld [vmem:[#allocation2 + $0xf8] ss:$12 sps:$4 sm:$0xff]  }
  0x96   :  { %879 = vmatprep.subr.bf16.mxu1 %v2060_v36  ;;  %v2096_v36 = vld [vmem:[#allocation2 + $0x38] ss:$12 sps:$4 sm:$0xff]  }
  0x99   :  { %880 = vmatpush1.bf16.msra.mxu1 %v2058_v37  ;;  %v2097_v37 = vld [vmem:[#allocation2 + $0x110] ss:$12 sps:$4 sm:$0xff]  }
  0x9a   :  { %881 = vmatprep.subr.bf16.mxu1 %v2063_v38  ;;  %v2098_v38 = vld [vmem:[#allocation2 + $0x50] ss:$12 sps:$4 sm:$0xff]  }
  0x9d   :  { %882 = vmatpush1.bf16.msra.mxu1 %v2061_v39  ;;  %v2099_v39 = vld [vmem:[#allocation2 + $0x128] ss:$12 sps:$4 sm:$0xff]  }
  0x9e   :  { %883 = vmatprep.subr.bf16.mxu1 %v2066_v40  ;;  %v2100_v40 = vld [vmem:[#allocation2 + $0x68] ss:$12 sps:$4 sm:$0xff]  }
  0xa1   :  { %884 = vmatpush1.bf16.msra.mxu1 %v2064_v41  ;;  %v2101_v41 = vld [vmem:[#allocation2 + $0x140] ss:$12 sps:$4 sm:$0xff]  }
  0xa2   :  { %894 = vmatprep.subr.bf16.mxu1 %v2069_v42  ;;  %v2102_v42 = vld [vmem:[#allocation2 + $0x80] ss:$12 sps:$4 sm:$0xff]  }
 0x137   :  { %v219_v52 = vpop.f32.mrb[0].mxu0  ;;  %v260_v53 = vpop.f32.mrb[0].mxu1 }
 0x138   :  { %v220_v54 = vadd.f32 %v219_v52, %v124_v49  ;;  %v221_v55 = vpop.f32.mrb[1].mxu0  ;;  %v262_v56 = vpop.f32.mrb[1].mxu1  ;;  %v261_v23 = vadd.f32 %v260_v53, %v132_v20  ;;  %v2106_v49 = vld [vmem:[#allocation2 + $0xb0] ss:$12 sps:$4 sm:$0xff]   ;;  %v2109_v52 = vld [vmem:[#allocation2 + $0x1b8] ss:$12 sps:$4 sm:$0xff]  }
 0x139   :  { %v222_v57 = vadd.f32 %v221_v55, %v128_v50  ;;  %v263_v58 = vadd.f32 %v262_v56, %v136_v51  ;;  %v264_v59 = vpop.f32.mrb[2].mxu1  ;;  %v223_v60 = vpop.f32.mrb[2].mxu0  ;;  %v2107_v50 = vld [vmem:[#allocation2 + $0x188] ss:$12 sps:$4 sm:$0xff]   ;;  %v2108_v51 = vld [vmem:[#allocation2 + $0x1a0] ss:$12 sps:$4 sm:$0xff]  }
 0x13a   :  { %v350_v61 = vmax.f32 %v220_v54, 0.0  ;;  %v265_v62 = vpop.f32.mrb[3].mxu1  ;;  %v224_v63 = vpop.f32.mrb[3].mxu0  ;;  %v352_v26 = vmax.f32 %v261_v23, 0.0  ;;  %v2110_v53 = vld [vmem:[#allocation2 + $0x1d0] ss:$12 sps:$4 sm:$0xff]  }
 0x13b   :  { %v351_v1 = vmax.f32 %v222_v57, 0.0  ;;  %v268_v2 = vsel %vm267_vm1, %v263_v58, -inf  ;;  %v2111_v54 = vld [vmem:[#allocation2 + $0x1e8] ss:$12 sps:$4 sm:$0xff]   ;;  %v2112_v55 = vld [vmem:[#allocation2 + $0x200] ss:$12 sps:$4 sm:$0xff]  }
 0x13c   :  { %v2463_v3 = vpack.c.bf16 %v350_v61, %v350_v61  ;;  %269 = vmax.xlane.f32.xlu0 %v268_v2  ;;  %v2473_v27 = vpack.c.bf16 %v352_v26, %v352_v26  ;;  %v2113_v56 = vld [vmem:[#allocation2 + $0x218] ss:$12 sps:$4 sm:$0xff]   ;;  %v2114_v57 = vld [vmem:[#allocation2 + $0x230] ss:$12 sps:$4 sm:$0xff]  }
 0x13d   :  { %v354_v4 = vpack.c.bf16 %v351_v1, %v351_v1  ;;  %v1019_v62 = vld [vmem:[%s2609_s6] sm:$0xff] }
 0x13e   :  { %v1773_v63 = vcombine.high %v1019_v62, %v1019_v62  ;;  %v1772_v1 = vcombine.low %v1019_v62, %v1019_v62  ;;  %v2123_v20 = vld [vmem:[#allocation9 + $0x50] sm:$0xff]  }
 0x13f   :  { %885 = vmatprep.mubr.bf16.mxu1 %v354_v4 }
 0x140   :  { %886 = vmatmul.mubr.bf16.vlgmr.msra.gmra.mrb[4].mxu1 %v2463_v3  ;;  %v1034_v2 = vsel %vm1032_vm3, %v1772_v1, 0 }
 0x141   :  { %895 = vmatpush1.bf16.msra.mxu1 %v2067_v5  ;;  %926 = vmatprep.mubr.bf16.mxu1 %v2283_v0  ;;  %v2131_v5 = vld [vmem:[#allocation9 + $0x98] sm:$0xff]  }
 0x142   :  { %896 = vmatprep.subr.bf16.mxu1 %v2072_v6  ;;  %v2134_v6 = vld [vmem:[#allocation9 + $0xa0] sm:$0xff]  }
 0x145   :  { %897 = vmatpush1.bf16.msra.mxu1 %v2070_v7 }
 0x146   :  { %898 = vmatprep.subr.bf16.mxu1 %v2075_v8 }
 0x149   :  { %899 = vmatpush1.bf16.msra.mxu1 %v2073_v9  ;;  %v2117_v9 = vld [vmem:[%s2609_s6 + $0x8] ss:$0 sps:$4 sm:$0xff]  }
 0x14a   :  { %900 = vmatprep.subr.bf16.mxu1 %v2078_v10 }
 0x14d   :  { %901 = vmatpush1.bf16.msra.mxu1 %v2076_v11 }
 0x14e   :  { %902 = vmatprep.subr.bf16.mxu1 %v2081_v12 }
 0x151   :  { %903 = vmatpush1.bf16.msra.mxu1 %v2079_v13  ;;  %v1040_v13 = vsel %vm1032_vm3, %v2117_v9, 0  ;;  %v2147_v9 = vld [vmem:[%s2613_s10 + $0x28] sm:$0xff]  }
 0x152   :  { %904 = vmatprep.subr.bf16.mxu1 %v2084_v14  ;;  %v2118_v14 = vld [vmem:[#allocation9 + $0x40] sm:$0xff]  }
 0x155   :  { %905 = vmatpush1.bf16.msra.mxu1 %v2082_v19  ;;  %v2121_v19 = vld [vmem:[#allocation9 + $0x8] sm:$0xff]  }
 0x156   :  { %906 = vmatprep.subr.bf16.mxu1 %v2087_v21  ;;  %v2124_v21 = vld [vmem:[#allocation9 + $0x10] sm:$0xff]  }
 0x159   :  { %907 = vmatpush1.bf16.msra.mxu1 %v2085_v22  ;;  %v2126_v22 = vld [vmem:[#allocation9 + $0x58] sm:$0xff]  }
 0x15a   :  { %908 = vmatprep.subr.bf16.mxu1 %v2090_v24 }
 0x15d   :  { %909 = vmatpush1.bf16.msra.mxu1 %v2088_v25  ;;  %v2127_v25 = vld [vmem:[#allocation9 + $0x18] sm:$0xff]  }
 0x15e   :  { %1932 = vmatprep.subr.bf16.mxu1 %v2284_v18 }
 0x160   :  { %927 = vmatmul.mubr.bf16.vlgmr.msra.gmra.mrb[4].mxu1 %v2473_v27 }
 0x161   :  { %1948 = vmatprep.mubr.msk.bf16.mxu1 %vm2285_vm2, %v2284_v18 }
 0x1c9   :  { %v270_v28 = vpop.xlane.xlu0 %269 }
 0x1ca   :  { %v271_v29 = vsub.f32 %v263_v58, %v270_v28  ;;  %v2129_v28 = vld [vmem:[#allocation9 + $0x60] sm:$0xff]  }
 0x1cc   :  { %v272_v30 = vmul.f32 1.442695, %v271_v29 }
 0x1ce   :  { %2154 = vpow2.f32 %v272_v30  ;;  %v2130_v30 = vld [vmem:[#allocation9 + $0x20] sm:$0xff]  }
 0x1d8   :  { %v2479_v33 = vpop.eup %2154 }
 0x1d9   :  { %1904 = vmatmul.mubr.msk.f32.vlgmr.msra.gmra.mrb[4].mxu0 %vm267_vm1, %v2479_v33 }
 0x1da   :  { %1822 = vmatpush3.bf16.msra.mxu0 %v2092_v31  ;;  %967 = vmatprep.mubr.bf16.mxu0 %v354_v4  ;;  %v2128_v4 = vld [vmem:[#allocation9 + $0x90] sm:$0xff]   ;;  %v2132_v31 = vld [vmem:[#allocation9 + $0x68] sm:$0xff]  }
 0x1db   :  { %1823 = vmatprep.subr.bf16.mxu0 %v2093_v32  ;;  %v2133_v32 = vld [vmem:[#allocation9 + $0x28] sm:$0xff]  }
 0x1de   :  { %1824 = vmatpush3.bf16.msra.mxu0 %v2094_v34  ;;  %v452_v34 = vld [vmem:[#allocation4] sm:$0x7] }
 0x1df   :  { %1825 = vmatprep.subr.bf16.mxu0 %v2095_v35  ;;  %v465_v35 = vrot.slane %v452_v34, %v131_v15  ;;  %v2141_v15 = vld [vmem:[#allocation9 + $0xb8] sm:$0xff]  }
 0x1e2   :  { %1826 = vmatpush3.bf16.msra.mxu0 %v2096_v36 }
 0x1e3   :  { %1827 = vmatprep.subr.bf16.mxu0 %v2097_v37 }
 0x1e6   :  { %1828 = vmatpush3.bf16.msra.mxu0 %v2098_v38 }
 0x1e7   :  { %1829 = vmatprep.subr.bf16.mxu0 %v2099_v39 }
 0x1ea   :  { %1830 = vmatpush3.bf16.msra.mxu0 %v2100_v40 }
 0x1eb   :  { %1831 = vmatprep.subr.bf16.mxu0 %v2101_v41 }
 0x1ee   :  { %1832 = vmatpush3.bf16.msra.mxu0 %v2102_v42  ;;  %v2136_v42 = vld [vmem:[#allocation9 + $0x30] sm:$0xff]  }
 0x1ef   :  { %1833 = vmatprep.subr.bf16.mxu0 %v2103_v43  ;;  %v2137_v43 = vld [vmem:[#allocation9 + $0xa8] sm:$0xff]  }
 0x1f2   :  { %1834 = vmatpush3.bf16.msra.mxu0 %v2104_v47  ;;  %v2138_v47 = vld [vmem:[#allocation9 + $0x78] sm:$0xff]  }
 0x1f3   :  { %1835 = vmatprep.subr.bf16.mxu0 %v2105_v48  ;;  %v2139_v48 = vld [vmem:[#allocation9 + $0x38] sm:$0xff]  }
 0x1f6   :  { %1836 = vmatpush3.bf16.msra.mxu0 %v2106_v49  ;;  %v2140_v49 = vld [vmem:[#allocation9 + $0xb0] sm:$0xff]  }
 0x1f7   :  { %1906 = vmatprep.subr.bf16.mxu0 %v2284_v18 }
 0x1f9   :  { %968 = vmatmul.mubr.bf16.vlgmr.msra.gmra.mrb[8].mxu0 %v2463_v3  ;;  %v2125_v3 = vld [vmem:[#allocation9 + $0x88] sm:$0xff]  }
 0x1fa   :  { %1907 = vmatpush3.bf16.msra.mxu0 %v2107_v50  ;;  %1922 = vmatprep.mubr.msk.bf16.mxu0 %vm2285_vm2, %v2284_v18  ;;  %v457_v50 = vrot.slane %v452_v34, %v123_v45  ;;  %v2142_v45 = vld [vmem:[%s2613_s10] sm:$0xff]  }
 0x1fb   :  { %1908 = vmatprep.subr.bf16.mxu0 %v2284_v18 }
 0x1fe   :  { %1909 = vmatpush3.bf16.msra.mxu0 %v2108_v51  ;;  %v461_v51 = vrot.slane %v452_v34, %v127_v46 }
 0x1ff   :  { %1910 = vmatprep.subr.bf16.mxu0 %v2284_v18 }
 0x202   :  { %1911 = vmatpush3.bf16.msra.mxu0 %v2109_v52 }
 0x203   :  { %1912 = vmatprep.subr.bf16.mxu0 %v2284_v18 }
 0x206   :  { %1913 = vmatpush3.bf16.msra.mxu0 %v2110_v53 }
 0x207   :  { %1914 = vmatprep.subr.bf16.mxu0 %v2284_v18 }
 0x20a   :  { %1915 = vmatpush3.bf16.msra.mxu0 %v2111_v54 }
 0x20b   :  { %1916 = vmatprep.subr.bf16.mxu0 %v2284_v18 }
 0x20e   :  { %1917 = vmatpush3.bf16.msra.mxu0 %v2112_v55 }
 0x20f   :  { %1918 = vmatprep.subr.bf16.mxu0 %v2284_v18 }
 0x212   :  { %1919 = vmatpush3.bf16.msra.mxu0 %v2113_v56 }
 0x213   :  { %1920 = vmatprep.subr.bf16.mxu0 %v2284_v18 }
 0x216   :  { %1921 = vmatpush3.bf16.msra.mxu0 %v2114_v57 }
 0x217   :  { %1775 = vmatprep.subr.msk.bf16.mxu0 %vm1032_vm3, %v1773_v63 }
 0x219   :  { %1923 = vmatmul.mubr.bf16.vlgmr.msra.gmra.mrb[12].mxu0 %v2473_v27 }
 0x21a   :  { %1074 = vmatprep.mubr.bf16.mxu0 %v2283_v0  ;;  %1043 = vmatpush1.bf16.msra.mxu0 %v1034_v2  ;;  %v2122_v0 = vld [vmem:[#allocation9 + $0x80] sm:$0xff]  }
 0x21b   :  { %1926 = vmatprep.subr.bf16.mxu0 %v2284_v18  ;;  %1933 = vmatpush3.bf16.msra.mxu1 %v2122_v0 }
 0x21c   :  { %1934 = vmatprep.subr.bf16.mxu1 %v2284_v18 }
 0x21f   :  { %1935 = vmatpush3.bf16.msra.mxu1 %v2125_v3 }
 0x220   :  { %1936 = vmatprep.subr.bf16.mxu1 %v2284_v18 }
 0x223   :  { %1937 = vmatpush3.bf16.msra.mxu1 %v2128_v4 }
 0x224   :  { %1938 = vmatprep.subr.bf16.mxu1 %v2284_v18 }
 0x227   :  { %1939 = vmatpush3.bf16.msra.mxu1 %v2131_v5 }
 0x228   :  { %1940 = vmatprep.subr.bf16.mxu1 %v2284_v18 }
 0x22b   :  { %1941 = vmatpush3.bf16.msra.mxu1 %v2134_v6  ;;  %v2144_v6 = vld [vmem:[%s2613_s10 + $0x10] sm:$0xff]  }
 0x22c   :  { %1942 = vmatprep.subr.bf16.mxu1 %v2284_v18 }
 0x22f   :  { %1943 = vmatpush3.bf16.msra.mxu1 %v2137_v43 }
 0x230   :  { %1944 = vmatprep.subr.bf16.mxu1 %v2284_v18 }
 0x233   :  { %v2496_v58 = vpop.f32.mrb[4].mxu1  ;;  %1945 = vmatpush3.bf16.msra.mxu1 %v2140_v49  ;;  %v1812_v49 = vld [vmem:[%s2616_s13] ss:$0 sm:$0xff] }
 0x234   :  { %v2498_v59 = vpop.f32.mrb[5].mxu1  ;;  %1946 = vmatprep.subr.bf16.mxu1 %v2284_v18  ;;  %v1989_v52 = vadd.f32 %v2496_v58, %v457_v50  ;;  %v2143_v58 = vld [vmem:[%s2613_s10 + $0x8] sm:$0xff]  }
 0x235   :  { %v932_v60 = vpop.f32.mrb[6].mxu1  ;;  %v1990_v53 = vadd.f32 %v2498_v59, %v461_v51 }
 0x236   :  { %v933_v61 = vpop.f32.mrb[7].mxu1  ;;  %v1015_v54 = vmax.f32 %v1989_v52, 0.0 }
 0x237   :  { %1947 = vmatpush3.bf16.msra.mxu1 %v2141_v15  ;;  %v1016_v55 = vmax.f32 %v1990_v53, 0.0 }
 0x238   :  { %1972 = vmatprep.subr.bf16.mxu1 %v2284_v18 }
 0x2ac   :  { %v344_v7 = vpop.f32.mrb[4].mxu0 }
 0x2ad   :  { %2156 = vrcp.f32 %v344_v7  ;;  %v1905_v8 = vpop.f32.mrb[5].mxu0  ;;  %v2145_v7 = vld [vmem:[%s2613_s10 + $0x18] sm:$0xff]  }
 0x2ae   :  { %v2146_v8 = vld [vmem:[%s2613_s10 + $0x20] sm:$0xff]  }
 0x2b7   :  { %v2157_v10 = vpop.eup %2156 }
 0x2b8   :  { %v2515_v11 = vmul.f32 %v2157_v10, %v2479_v33  ;;  %v2135_v33 = vld [vmem:[#allocation9 + $0x70] sm:$0xff]   ;;  %v2148_v10 = vld [vmem:[%s2613_s10 + $0x30] sm:$0xff]  }
 0x2ba   :  { %v1018_v12 = vpack.c.bf16 %v2515_v11, %v2515_v11 }
 0x2bc   :  { %1776 = vmatmul.mubr.msk.bf16.vlgmr.msra.gmra.mrb[16].mxu0 %vm267_vm1, %v1018_v12 }
 0x2bd   :  { %1927 = vmatpush3.bf16.msra.mxu0 %v1040_v13  ;;  %1928 = vmatprep.mubr.msk.bf16.mxu0 %vm2285_vm2, %v2284_v18  ;;  %v2150_v13 = vld [vmem:[%s2615_s12] sm:$0xff]  }
 0x2be   :  { %1854 = vmatprep.subr.bf16.mxu0 %v2118_v14  ;;  %v2151_v14 = vld [vmem:[%s2615_s12 + $0x8] sm:$0xff]  }
 0x2c4   :  { %1929 = vmatmul.mubr.msk.bf16.vlgmr.msra.gmra.mrb[20].mxu0 %vm267_vm1, %v1018_v12  ;;  %v2149_v12 = vld [vmem:[%s2613_s10 + $0x38] sm:$0xff]  }
 0x2c5   :  { %1855 = vmatpush3.bf16.msra.mxu0 %v2119_v16  ;;  %v2152_v16 = vld [vmem:[%s2615_s12 + $0x10] sm:$0xff]  }
 0x2c6   :  { %1856 = vmatprep.subr.bf16.mxu0 %v2120_v17 }
 0x2c9   :  { %1857 = vmatpush3.bf16.msra.mxu0 %v2121_v19 }
 0x2ca   :  { %1858 = vmatprep.subr.bf16.mxu0 %v2123_v20  ;;  %v1778_v20 = vld [vmem:[%s2612_s9] ss:$0 sm:$0xff] }
 0x2cc   :  { %v1837_v23 = vpop.f32.mrb[8].mxu0 }
 0x2cd   :  { %v1838_v24 = vpop.f32.mrb[9].mxu0  ;;  %1859 = vmatpush3.bf16.msra.mxu0 %v2124_v21 }
 0x2ce   :  { %v1839_v26 = vadd.f32 %v1838_v24, %v1837_v23  ;;  %v1840_v27 = vpop.f32.mrb[10].mxu0  ;;  %1860 = vmatprep.subr.bf16.mxu0 %v2126_v22 }
 0x2cf   :  { %v1841_v29 = vpop.f32.mrb[11].mxu0 }
 0x2d0   :  { %v970_v36 = vadd.f32 %v1839_v26, %v465_v35 }
 0x2d1   :  { %1861 = vmatpush3.bf16.msra.mxu0 %v2127_v25 }
 0x2d2   :  { %1862 = vmatprep.subr.bf16.mxu0 %v2129_v28 }
 0x2d5   :  { %1863 = vmatpush3.bf16.msra.mxu0 %v2130_v30 }
 0x2d6   :  { %1864 = vmatprep.subr.bf16.mxu0 %v2132_v31 }
 0x2d9   :  { %1865 = vmatpush3.bf16.msra.mxu0 %v2133_v32  ;;  %v2153_v32 = vld [vmem:[%s2615_s12 + $0x18] sm:$0xff]  }
 0x2da   :  { %1866 = vmatprep.subr.bf16.mxu0 %v2135_v33  ;;  %v1803_v33 = vld [vmem:[%s2614_s11] ss:$0 sm:$0xff] }
 0x2dd   :  { %1867 = vmatpush3.bf16.msra.mxu0 %v2136_v42 }
 0x2de   :  { %1868 = vmatprep.subr.bf16.mxu0 %v2138_v47 }
 0x2e1   :  { %1869 = vmatpush3.bf16.msra.mxu0 %v2139_v48 }
 0x2e2   :  { %1952 = vmatprep.subr.bf16.mxu0 %v2284_v18 }
 0x2ec   :  { %v1009_v37 = vpop.f32.mrb[12].mxu0 }
 0x2ed   :  { %v1010_v38 = vadd.f32 %v1009_v37, %v970_v36  ;;  %v1924_v39 = vpop.f32.mrb[13].mxu0 }
 0x2ee   :  { %v1012_v40 = vpop.f32.mrb[14].mxu0 }
 0x2ef   :  { %v1925_v41 = vpop.f32.mrb[15].mxu0  ;;  %v1017_v44 = vmax.f32 %v1010_v38, 0.0 }
 0x2f0   :  { %v1606_v41 = vld [vmem:[#allocation7] sm:$0xff] }
 0x38f   :  { %v1076_v56 = vpop.f32.mrb[16].mxu0 }
 0x390   :  { %v1123_v57 = vmul.f32 %v1076_v56, %v1015_v54  ;;  %v1078_v60 = vpop.f32.mrb[17].mxu0 }
 0x391   :  { %v1124_v61 = vmul.f32 %v1078_v60, %v1016_v55  ;;  %v1080_v62 = vpop.f32.mrb[18].mxu0 }
 0x392   :  { %v1081_v63 = vpop.f32.mrb[19].mxu0  ;;  %v1126_v2 = vpack.c.bf16 %v1123_v57, %v1123_v57 }
 0x393   :  { %v1127_v1 = vpack.c.bf16 %v1124_v61, %v1124_v61 }
 0x395   :  { %1360 = vmatprep.mubr.bf16.mxu0 %v1127_v1 }
 0x396   :  { %1361 = vmatmul.mubr.bf16.vlgmr.msra.gmra.mrb[24].mxu0 %v1126_v2 }
 0x397   :  { %v1117_v46 = vpop.f32.mrb[20].mxu0  ;;  %1953 = vmatpush3.bf16.msra.mxu0 %v2142_v45  ;;  %1968 = vmatprep.mubr.msk.bf16.mxu0 %vm2285_vm2, %v2284_v18 }
 0x398   :  { %v1125_v59 = vmul.f32 %v1117_v46, %v1017_v44  ;;  %v1930_v0 = vpop.f32.mrb[21].mxu0  ;;  %1954 = vmatprep.subr.bf16.mxu0 %v2284_v18 }
 0x399   :  { %v1120_v3 = vpop.f32.mrb[22].mxu0 }
 0x39a   :  { %v1128_v4 = vpack.c.bf16 %v1125_v59, %v1125_v59  ;;  %v1931_v5 = vpop.f32.mrb[23].mxu0 }
 0x39b   :  { %1955 = vmatpush3.bf16.msra.mxu0 %v2143_v58 }
 0x39c   :  { %1949 = vmatmul.mubr.bf16.vlgmr.msra.gmra.mrb[8].mxu1 %v1128_v4  ;;  %1956 = vmatprep.subr.bf16.mxu0 %v2284_v18 }
 0x39d   :  { %1980 = vmatprep.mubr.msk.bf16.mxu1 %vm2285_vm2, %v2284_v18  ;;  %1973 = vmatpush3.bf16.msra.mxu1 %v2150_v13 }
 0x39e   :  { %1974 = vmatprep.subr.bf16.mxu1 %v2284_v18 }
 0x39f   :  { %1957 = vmatpush3.bf16.msra.mxu0 %v2144_v6 }
 0x3a0   :  { %1958 = vmatprep.subr.bf16.mxu0 %v2284_v18 }
 0x3a1   :  { %1975 = vmatpush3.bf16.msra.mxu1 %v2151_v14 }
 0x3a2   :  { %1976 = vmatprep.subr.bf16.mxu1 %v2284_v18 }
 0x3a3   :  { %1959 = vmatpush3.bf16.msra.mxu0 %v2145_v7 }
 0x3a4   :  { %1960 = vmatprep.subr.bf16.mxu0 %v2284_v18 }
 0x3a5   :  { %1977 = vmatpush3.bf16.msra.mxu1 %v2152_v16 }
 0x3a6   :  { %1978 = vmatprep.subr.bf16.mxu1 %v2284_v18 }
 0x3a7   :  { %1961 = vmatpush3.bf16.msra.mxu0 %v2146_v8 }
 0x3a8   :  { %1962 = vmatprep.subr.bf16.mxu0 %v2284_v18 }
 0x3a9   :  { %1979 = vmatpush3.bf16.msra.mxu1 %v2153_v32 }
 0x3aa   :  { %1984 = vmatprep.subr.mxu1 %v2284_v18 }
 0x3ab   :  { %1963 = vmatpush3.bf16.msra.mxu0 %v2147_v9 }
 0x3ac   :  { %1964 = vmatprep.subr.bf16.mxu0 %v2284_v18 }
 0x3af   :  { %1965 = vmatpush3.bf16.msra.mxu0 %v2148_v10 }
 0x3b0   :  { %1966 = vmatprep.subr.bf16.mxu0 %v2284_v18 }
 0x3b3   :  { %1967 = vmatpush3.bf16.msra.mxu0 %v2149_v12 }
 0x469   :  { %v1870_v17 = vpop.f32.mrb[24].mxu0 }
 0x46a   :  { %v1871_v19 = vpop.f32.mrb[25].mxu0 }
 0x46b   :  { %v1872_v21 = vadd.f32 %v1871_v19, %v1870_v17  ;;  %v1873_v22 = vpop.f32.mrb[26].mxu0 }
 0x46c   :  { %v1874_v23 = vpop.f32.mrb[27].mxu0 }
 0x46d   :  { %v1363_v24 = vadd.f32 %v1872_v21, %v1778_v20 }
 0x46f   :  { %v1402_v25 = vpop.f32.mrb[8].mxu1 }
 0x470   :  { %v1403_v26 = vadd.f32 %v1402_v25, %v1363_v24  ;;  %v1950_v27 = vpop.f32.mrb[9].mxu1 }
 0x471   :  { %v1405_v28 = vpop.f32.mrb[10].mxu1 }
 0x472   :  { %v1408_v29 = vmax.f32 %v1403_v26, 0.0  ;;  %v1951_v30 = vpop.f32.mrb[11].mxu1 }
 0x474   :  { %v1409_v31 = vpack.c.bf16 %v1408_v29, %v1408_v29 }
 0x476   :  { %1969 = vmatmul.mubr.bf16.vlgmr.msra.gmra.mrb[28].mxu0 %v1409_v31 }
 0x549   :  { %v1515_v34 = vpop.f32.mrb[28].mxu0 }
 0x54a   :  { %v1516_v35 = vadd.f32 %v1803_v33, %v1515_v34  ;;  %v1970_v36 = vpop.f32.mrb[29].mxu0 }
 0x54b   :  { %v1518_v37 = vpop.f32.mrb[30].mxu0 }
 0x54c   :  { %v1521_v38 = vmax.f32 %v1516_v35, 0.0  ;;  %v1971_v39 = vpop.f32.mrb[31].mxu0 }
 0x54e   :  { %v1522_v40 = vpack.c.bf16 %v1521_v38, %v1521_v38 }
 0x550   :  { %1981 = vmatmul.mubr.msk.bf16.vlgmr.msra.gmra.mrb[12].mxu1 %vm1562_vm4, %v1522_v40 }
 0x551   :  { %1985 = vmatpush3.msra.mxu1 %v1606_v41  ;;  %1986 = vmatprep.mubr.msk.f32.mxu1 %vm2285_vm2, %v2284_v18 }
 0x558   :  { %1987 = vmatmul.mubr.msk.f32.vlgmr.msra.gmra.mrb[16].mxu1 %vm267_vm1, %v2515_v11 }
 0x623   :  { %v1600_v42 = vpop.f32.mrb[12].mxu1 }
 0x624   :  { %v1982_v43 = vpop.f32.mrb[13].mxu1  ;;  %v1601_v15 = vadd.f32 %v1812_v49, %v1600_v42 }
 0x625   :  { %v1603_v47 = vpop.f32.mrb[14].mxu1 }
 0x626   :  { %v1983_v48 = vpop.f32.mrb[15].mxu1 }
 0x62b   :  { %v1676_v50 = vpop.f32.mrb[16].mxu1 }
 0x62c   :  { %v1680_v51 = vadd.f32 %v1676_v50, %v1601_v15  ;;  %v1988_v52 = vpop.f32.mrb[17].mxu1 }
 0x62e   :  { %1681 = vst [vmem:[%s2617_s14] sm:$0xff] %v1680_v51 }
 0x62f   :  { %1686 = vsyncpa [#allocation3], 1 }
 0x630   :  { %1687 = vsyncpa [#allocation5], 1 }
 0x631   :  { %1688 = vsyncpa [#allocation8], 1 }

</bundles_post_ra>
